<compile_context>
chip_gen: v7x
topology: tpu7x:2x2x1
jax: 0.10.0
libtpu: 0.0.40
codegen_flags: <defaults>
</compile_context>

<pallas_src>
import functools

import numpy as np
import jax
import jax.numpy as jnp
from jax import lax
from jax.experimental import pallas as pl
from jax.experimental.pallas import tpu as pltpu

_SUBLANE = 8
_LANE = 128


def _round_up(n, m):
    return ((n + m - 1) // m) * m


def _encode_kernel(T, Bp, D, H, rows, x_ref, w_ref, out_ref):
    """Single-invocation kernel: full LSTM recurrence + fused, padded output projection.

    x_ref:   (T*Bp, D)    -- input, batch pre-padded to Bp (multiple of 8)
    w_ref:   (96, 128)    -- packed slab: [wih | whh | b | w2 | b2], 8-row aligned
    out_ref: (Bp, 128)    -- padded [mu | logvar | 0...]
    """
    r_wih, r_whh, r_b, r_w2, r_b2 = rows
    wih = w_ref[r_wih:r_wih + D, :]        # (D, LW)  (lanes >= 4H, zero padded)
    whh = w_ref[r_whh:r_whh + H, :]        # (H, LW)
    b = w_ref[r_b:r_b + 1, :]              # (1, LW)
    w2 = w_ref[r_w2:r_w2 + H, :]           # (H, LW)  (first 2Z lanes valid)
    b2 = w_ref[r_b2:r_b2 + 1, :]           # (1, LW)

    # Hoisted input projection: one batched matmul + one bias broadcast, off the
    # serial recurrence chain.
    xw = jnp.dot(x_ref[...], wih, preferred_element_type=jnp.float32) + b   # (T*Bp, LW)

    # t == 0 peeled: h == 0 and c == 0, so no h@whh and no f*c term.
    g0 = xw[0:Bp, :]
    sig = jax.nn.sigmoid(g0)
    th = jnp.tanh(g0)
    c = sig[:, 0 * H:1 * H] * th[:, 2 * H:3 * H]          # i * g
    h = sig[:, 3 * H:4 * H] * jnp.tanh(c)                 # o * tanh(c)

    # Remaining steps: recurrent state lives in vregs; statically unrolled (T small, static).
    for t in range(1, T):
        gates = xw[t * Bp:(t + 1) * Bp, :] + jnp.dot(
            h, whh, preferred_element_type=jnp.float32)    # (Bp, LW), one vreg slice of xw
        sig = jax.nn.sigmoid(gates)                        # whole-vreg transcendentals
        th = jnp.tanh(gates)
        c = sig[:, 1 * H:2 * H] * c + sig[:, 0 * H:1 * H] * th[:, 2 * H:3 * H]
        h = sig[:, 3 * H:4 * H] * jnp.tanh(c)

    # lstm_out[-1, :, :] == h after the last step; dropout is identity (eval).
    # Fused mu/logvar projection against the lane-padded w2 -> one (Bp,128) unmasked store.
    out_ref[...] = jnp.dot(h, w2, preferred_element_type=jnp.float32) + b2


def _pack_slab(wih_t, whh_t, b, w2_t, b2):
    """Pack all weights/biases into one lane-128 slab; each piece 8-row aligned."""
    D, H4 = wih_t.shape
    H = whh_t.shape[0]
    Z2 = w2_t.shape[1]
    LW = _round_up(max(H4, Z2, _LANE), _LANE)

    r_wih = 0
    r_whh = r_wih + _round_up(D, _SUBLANE)
    r_b = r_whh + _round_up(H, _SUBLANE)
    r_w2 = r_b + _SUBLANE
    r_b2 = r_w2 + _round_up(H, _SUBLANE)
    n_rows = r_b2 + _SUBLANE

    slab = jnp.zeros((n_rows, LW), jnp.float32)
    slab = slab.at[r_wih:r_wih + D, :H4].set(wih_t)
    slab = slab.at[r_whh:r_whh + H, :H4].set(whh_t)
    slab = slab.at[r_b:r_b + 1, :H4].set(b)
    slab = slab.at[r_w2:r_w2 + H, :Z2].set(w2_t)
    slab = slab.at[r_b2:r_b2 + 1, :Z2].set(b2)
    return slab, (r_wih, r_whh, r_b, r_w2, r_b2)


def encode_forward(x, params):
    T, B, D = x.shape
    H = params["whh_t"].shape[0]
    Z2 = params["w2_t"].shape[1]
    Z = Z2 // 2
    Bp = _round_up(B, _SUBLANE)

    slab = params["slab"]
    rows = params["slab_rows"]
    LW = slab.shape[1]

    # Pad batch to a full sublane group so every per-step gate tile is one vreg.
    if Bp != B:
        x = jnp.pad(x, ((0, 0), (0, Bp - B), (0, 0)))
    x2d = x.reshape(T * Bp, D)

    vmem = pl.BlockSpec(memory_space=pltpu.MemorySpace.VMEM)
    out = pl.pallas_call(
        functools.partial(_encode_kernel, T, Bp, D, H, rows),
        out_shape=jax.ShapeDtypeStruct((Bp, LW), jnp.float32),
        in_specs=[vmem, vmem],
        out_specs=vmem,
    )(x2d, slab)

    mu = out[:B, :Z]
    logvar = out[:B, Z:Z2]
    return mu, logvar


def init_params(key, x_dim, z_dim, hidden_dim):
    """Deterministic synthetic params mirroring the PyTorch module's shapes/init."""
    k = float(1.0 / np.sqrt(hidden_dim))          # PyTorch LSTM default init range
    ks = jax.random.split(key, 6)
    wih = jax.random.uniform(ks[0], (4 * hidden_dim, x_dim),
                             minval=-k, maxval=k, dtype=jnp.float32)
    whh = jax.random.uniform(ks[1], (4 * hidden_dim, hidden_dim),
                             minval=-k, maxval=k, dtype=jnp.float32)
    bih = jax.random.uniform(ks[2], (4 * hidden_dim,),
                             minval=-k, maxval=k, dtype=jnp.float32)
    bhh = jax.random.uniform(ks[3], (4 * hidden_dim,),
                             minval=-k, maxval=k, dtype=jnp.float32)
    # init_weights(): fc21/fc22 weight ~ U(-0.1, 0.1), bias = 0
    w21 = jax.random.uniform(ks[4], (z_dim, hidden_dim),
                             minval=-0.1, maxval=0.1, dtype=jnp.float32)
    w22 = jax.random.uniform(ks[5], (z_dim, hidden_dim),
                             minval=-0.1, maxval=0.1, dtype=jnp.float32)
    b21 = jnp.zeros((z_dim,), jnp.float32)
    b22 = jnp.zeros((z_dim,), jnp.float32)

    wih_t = wih.T                                   # (D, 4H)
    whh_t = whh.T                                   # (H, 4H)
    b = (bih + bhh)[None, :]                        # (1, 4H)
    w2_t = jnp.concatenate([w21.T, w22.T], axis=1)  # (H, 2Z)
    b2 = jnp.concatenate([b21, b22])[None, :]       # (1, 2Z)

    slab, rows = _pack_slab(wih_t, whh_t, b, w2_t, b2)

    return dict(
        # Packed slab for the kernel (single DMA):
        slab=slab, slab_rows=rows,
        # Unpacked copies kept for the pure-JAX reference / shape queries:
        wih_t=wih_t, whh_t=whh_t, b=b, w2_t=w2_t, b2=b2,
        w21_t=w21.T, b21=b21[None, :],
        w22_t=w22.T, b22=b22[None, :],
    )


def encode_ref(x, params):
    """Pure-JAX reference (matches PyTorch nn.LSTM + Linear semantics in eval mode)."""
    H = params["whh_t"].shape[0]
    B = x.shape[1]

    def step(carry, x_t):
        h, c = carry
        gates = x_t @ params["wih_t"] + h @ params["whh_t"] + params["b"]
        i = jax.nn.sigmoid(gates[:, 0 * H:1 * H])
        f = jax.nn.sigmoid(gates[:, 1 * H:2 * H])
        g = jnp.tanh(gates[:, 2 * H:3 * H])
        o = jax.nn.sigmoid(gates[:, 3 * H:4 * H])
        c = f * c + i * g
        h = o * jnp.tanh(c)
        return (h, c), None

    h0 = jnp.zeros((B, H), jnp.float32)
    c0 = jnp.zeros((B, H), jnp.float32)
    (h, _), _ = lax.scan(step, (h0, c0), x)
    mu = h @ params["w21_t"] + params["b21"]
    logvar = h @ params["w22_t"] + params["b22"]
    return mu, logvar


if __name__ == "__main__":
    # Small shapes consistent with the module: seq=8, batch=2, x_dim=16,
    # hidden_dim=32, z_dim=8 (vocab_size / dropout don't affect the eval forward).
    T, B, X_DIM, HIDDEN, Z_DIM = 8, 2, 16, 32, 8

    key = jax.random.PRNGKey(0)
    k_x, k_p = jax.random.split(key)
    x = jax.random.normal(k_x, (T, B, X_DIM), dtype=jnp.float32)
    params = init_params(k_p, X_DIM, Z_DIM, HIDDEN)

    mu, logvar = encode_forward(x, params)
    jax.block_until_ready((mu, logvar))

    mu_ref, logvar_ref = encode_ref(x, params)
    np.testing.assert_allclose(np.asarray(mu), np.asarray(mu_ref),
                               rtol=1e-4, atol=1e-4)
    np.testing.assert_allclose(np.asarray(logvar), np.asarray(logvar_ref),
                               rtol=1e-4, atol=1e-4)

    print("KERNEL_OK")
</pallas_src>

<mosaic_0001>
module attributes {stable_mosaic.version = 11 : i64} {
  func.func @_encode_kernel(%arg0: memref<64x16xf32, #tpu.memory_space<vmem>>, %arg1: memref<96x128xf32, #tpu.memory_space<vmem>>, %arg2: memref<8x128xf32, #tpu.memory_space<vmem>>) attributes {dimension_semantics = [], scalar_prefetch = 0 : i64, scratch_operands = 0 : i64, tpu.core_type = #tpu.core_type<tc>} {
    %c0 = arith.constant 0 : index
    %c0_0 = arith.constant 0 : index
    %0 = vector.load %arg1[%c0, %c0_0] : memref<96x128xf32, #tpu.memory_space<vmem>>, vector<16x128xf32>
    %c16 = arith.constant 16 : index
    %c0_1 = arith.constant 0 : index
    %1 = vector.load %arg1[%c16, %c0_1] : memref<96x128xf32, #tpu.memory_space<vmem>>, vector<32x128xf32>
    %c48 = arith.constant 48 : index
    %c0_2 = arith.constant 0 : index
    %2 = vector.load %arg1[%c48, %c0_2] : memref<96x128xf32, #tpu.memory_space<vmem>>, vector<1x128xf32>
    %c56 = arith.constant 56 : index
    %c0_3 = arith.constant 0 : index
    %3 = vector.load %arg1[%c56, %c0_3] : memref<96x128xf32, #tpu.memory_space<vmem>>, vector<32x128xf32>
    %c88 = arith.constant 88 : index
    %c0_4 = arith.constant 0 : index
    %4 = vector.load %arg1[%c88, %c0_4] : memref<96x128xf32, #tpu.memory_space<vmem>>, vector<1x128xf32>
    %c0_5 = arith.constant 0 : index
    %c0_6 = arith.constant 0 : index
    %5 = vector.load %arg0[%c0_5, %c0_6] : memref<64x16xf32, #tpu.memory_space<vmem>>, vector<64x16xf32>
    %cst = arith.constant dense<0.000000e+00> : vector<64x128xf32>
    %6 = tpu.matmul %5, %0, %cst {dimension_numbers = #tpu.dot_dimension_numbers<[1], [0], [0], [1], [0, 0, 1, 1], [], []>} : vector<64x16xf32>, vector<16x128xf32>, vector<64x128xf32> -> vector<64x128xf32>
    %7 = vector.broadcast %2 : vector<1x128xf32> to vector<64x128xf32>
    %8 = arith.addf %6, %7 : vector<64x128xf32>
    %9 = vector.extract_strided_slice %8 {offsets = [0, 0], sizes = [8, 128], strides = [1, 1]} : vector<64x128xf32> to vector<8x128xf32>
    %10 = arith.negf %9 : vector<8x128xf32>
    %11 = math.exp %10 : vector<8x128xf32>
    %cst_7 = arith.constant 1.000000e+00 : f32
    %12 = vector.broadcast %cst_7 : f32 to vector<8x128xf32>
    %13 = arith.addf %12, %11 : vector<8x128xf32>
    %14 = arith.divf %12, %13 : vector<8x128xf32>
    %15 = math.tanh %9 : vector<8x128xf32>
    %16 = vector.extract_strided_slice %14 {offsets = [0, 0], sizes = [8, 32], strides = [1, 1]} : vector<8x128xf32> to vector<8x32xf32>
    %17 = vector.extract_strided_slice %15 {offsets = [0, 64], sizes = [8, 32], strides = [1, 1]} : vector<8x128xf32> to vector<8x32xf32>
    %18 = arith.mulf %16, %17 : vector<8x32xf32>
    %19 = vector.extract_strided_slice %14 {offsets = [0, 96], sizes = [8, 32], strides = [1, 1]} : vector<8x128xf32> to vector<8x32xf32>
    %20 = math.tanh %18 : vector<8x32xf32>
    %21 = arith.mulf %19, %20 : vector<8x32xf32>
    %22 = vector.extract_strided_slice %8 {offsets = [8, 0], sizes = [8, 128], strides = [1, 1]} : vector<64x128xf32> to vector<8x128xf32>
    %cst_8 = arith.constant dense<0.000000e+00> : vector<8x128xf32>
    %23 = tpu.matmul %21, %1, %cst_8 {dimension_numbers = #tpu.dot_dimension_numbers<[1], [0], [0], [1], [0, 0, 1, 1], [], []>} : vector<8x32xf32>, vector<32x128xf32>, vector<8x128xf32> -> vector<8x128xf32>
    %24 = arith.addf %22, %23 : vector<8x128xf32>
    %25 = arith.negf %24 : vector<8x128xf32>
    %26 = math.exp %25 : vector<8x128xf32>
    %cst_9 = arith.constant 1.000000e+00 : f32
    %27 = vector.broadcast %cst_9 : f32 to vector<8x128xf32>
    %28 = arith.addf %27, %26 : vector<8x128xf32>
    %29 = arith.divf %27, %28 : vector<8x128xf32>
    %30 = math.tanh %24 : vector<8x128xf32>
    %31 = vector.extract_strided_slice %29 {offsets = [0, 32], sizes = [8, 32], strides = [1, 1]} : vector<8x128xf32> to vector<8x32xf32>
    %32 = arith.mulf %31, %18 : vector<8x32xf32>
    %33 = vector.extract_strided_slice %29 {offsets = [0, 0], sizes = [8, 32], strides = [1, 1]} : vector<8x128xf32> to vector<8x32xf32>
    %34 = vector.extract_strided_slice %30 {offsets = [0, 64], sizes = [8, 32], strides = [1, 1]} : vector<8x128xf32> to vector<8x32xf32>
    %35 = arith.mulf %33, %34 : vector<8x32xf32>
    %36 = arith.addf %32, %35 : vector<8x32xf32>
    %37 = vector.extract_strided_slice %29 {offsets = [0, 96], sizes = [8, 32], strides = [1, 1]} : vector<8x128xf32> to vector<8x32xf32>
    %38 = math.tanh %36 : vector<8x32xf32>
    %39 = arith.mulf %37, %38 : vector<8x32xf32>
    %40 = vector.extract_strided_slice %8 {offsets = [16, 0], sizes = [8, 128], strides = [1, 1]} : vector<64x128xf32> to vector<8x128xf32>
    %cst_10 = arith.constant dense<0.000000e+00> : vector<8x128xf32>
    %41 = tpu.matmul %39, %1, %cst_10 {dimension_numbers = #tpu.dot_dimension_numbers<[1], [0], [0], [1], [0, 0, 1, 1], [], []>} : vector<8x32xf32>, vector<32x128xf32>, vector<8x128xf32> -> vector<8x128xf32>
    %42 = arith.addf %40, %41 : vector<8x128xf32>
    %43 = arith.negf %42 : vector<8x128xf32>
    %44 = math.exp %43 : vector<8x128xf32>
    %cst_11 = arith.constant 1.000000e+00 : f32
    %45 = vector.broadcast %cst_11 : f32 to vector<8x128xf32>
    %46 = arith.addf %45, %44 : vector<8x128xf32>
    %47 = arith.divf %45, %46 : vector<8x128xf32>
    %48 = math.tanh %42 : vector<8x128xf32>
    %49 = vector.extract_strided_slice %47 {offsets = [0, 32], sizes = [8, 32], strides = [1, 1]} : vector<8x128xf32> to vector<8x32xf32>
    %50 = arith.mulf %49, %36 : vector<8x32xf32>
    %51 = vector.extract_strided_slice %47 {offsets = [0, 0], sizes = [8, 32], strides = [1, 1]} : vector<8x128xf32> to vector<8x32xf32>
    %52 = vector.extract_strided_slice %48 {offsets = [0, 64], sizes = [8, 32], strides = [1, 1]} : vector<8x128xf32> to vector<8x32xf32>
    %53 = arith.mulf %51, %52 : vector<8x32xf32>
    %54 = arith.addf %50, %53 : vector<8x32xf32>
    %55 = vector.extract_strided_slice %47 {offsets = [0, 96], sizes = [8, 32], strides = [1, 1]} : vector<8x128xf32> to vector<8x32xf32>
    %56 = math.tanh %54 : vector<8x32xf32>
    %57 = arith.mulf %55, %56 : vector<8x32xf32>
    %58 = vector.extract_strided_slice %8 {offsets = [24, 0], sizes = [8, 128], strides = [1, 1]} : vector<64x128xf32> to vector<8x128xf32>
    %cst_12 = arith.constant dense<0.000000e+00> : vector<8x128xf32>
    %59 = tpu.matmul %57, %1, %cst_12 {dimension_numbers = #tpu.dot_dimension_numbers<[1], [0], [0], [1], [0, 0, 1, 1], [], []>} : vector<8x32xf32>, vector<32x128xf32>, vector<8x128xf32> -> vector<8x128xf32>
    %60 = arith.addf %58, %59 : vector<8x128xf32>
    %61 = arith.negf %60 : vector<8x128xf32>
    %62 = math.exp %61 : vector<8x128xf32>
    %cst_13 = arith.constant 1.000000e+00 : f32
    %63 = vector.broadcast %cst_13 : f32 to vector<8x128xf32>
    %64 = arith.addf %63, %62 : vector<8x128xf32>
    %65 = arith.divf %63, %64 : vector<8x128xf32>
    %66 = math.tanh %60 : vector<8x128xf32>
    %67 = vector.extract_strided_slice %65 {offsets = [0, 32], sizes = [8, 32], strides = [1, 1]} : vector<8x128xf32> to vector<8x32xf32>
    %68 = arith.mulf %67, %54 : vector<8x32xf32>
    %69 = vector.extract_strided_slice %65 {offsets = [0, 0], sizes = [8, 32], strides = [1, 1]} : vector<8x128xf32> to vector<8x32xf32>
    %70 = vector.extract_strided_slice %66 {offsets = [0, 64], sizes = [8, 32], strides = [1, 1]} : vector<8x128xf32> to vector<8x32xf32>
    %71 = arith.mulf %69, %70 : vector<8x32xf32>
    %72 = arith.addf %68, %71 : vector<8x32xf32>
    %73 = vector.extract_strided_slice %65 {offsets = [0, 96], sizes = [8, 32], strides = [1, 1]} : vector<8x128xf32> to vector<8x32xf32>
    %74 = math.tanh %72 : vector<8x32xf32>
    %75 = arith.mulf %73, %74 : vector<8x32xf32>
    %76 = vector.extract_strided_slice %8 {offsets = [32, 0], sizes = [8, 128], strides = [1, 1]} : vector<64x128xf32> to vector<8x128xf32>
    %cst_14 = arith.constant dense<0.000000e+00> : vector<8x128xf32>
    %77 = tpu.matmul %75, %1, %cst_14 {dimension_numbers = #tpu.dot_dimension_numbers<[1], [0], [0], [1], [0, 0, 1, 1], [], []>} : vector<8x32xf32>, vector<32x128xf32>, vector<8x128xf32> -> vector<8x128xf32>
    %78 = arith.addf %76, %77 : vector<8x128xf32>
    %79 = arith.negf %78 : vector<8x128xf32>
    %80 = math.exp %79 : vector<8x128xf32>
    %cst_15 = arith.constant 1.000000e+00 : f32
    %81 = vector.broadcast %cst_15 : f32 to vector<8x128xf32>
    %82 = arith.addf %81, %80 : vector<8x128xf32>
    %83 = arith.divf %81, %82 : vector<8x128xf32>
    %84 = math.tanh %78 : vector<8x128xf32>
    %85 = vector.extract_strided_slice %83 {offsets = [0, 32], sizes = [8, 32], strides = [1, 1]} : vector<8x128xf32> to vector<8x32xf32>
    %86 = arith.mulf %85, %72 : vector<8x32xf32>
    %87 = vector.extract_strided_slice %83 {offsets = [0, 0], sizes = [8, 32], strides = [1, 1]} : vector<8x128xf32> to vector<8x32xf32>
    %88 = vector.extract_strided_slice %84 {offsets = [0, 64], sizes = [8, 32], strides = [1, 1]} : vector<8x128xf32> to vector<8x32xf32>
    %89 = arith.mulf %87, %88 : vector<8x32xf32>
    %90 = arith.addf %86, %89 : vector<8x32xf32>
    %91 = vector.extract_strided_slice %83 {offsets = [0, 96], sizes = [8, 32], strides = [1, 1]} : vector<8x128xf32> to vector<8x32xf32>
    %92 = math.tanh %90 : vector<8x32xf32>
    %93 = arith.mulf %91, %92 : vector<8x32xf32>
    %94 = vector.extract_strided_slice %8 {offsets = [40, 0], sizes = [8, 128], strides = [1, 1]} : vector<64x128xf32> to vector<8x128xf32>
    %cst_16 = arith.constant dense<0.000000e+00> : vector<8x128xf32>
    %95 = tpu.matmul %93, %1, %cst_16 {dimension_numbers = #tpu.dot_dimension_numbers<[1], [0], [0], [1], [0, 0, 1, 1], [], []>} : vector<8x32xf32>, vector<32x128xf32>, vector<8x128xf32> -> vector<8x128xf32>
    %96 = arith.addf %94, %95 : vector<8x128xf32>
    %97 = arith.negf %96 : vector<8x128xf32>
    %98 = math.exp %97 : vector<8x128xf32>
    %cst_17 = arith.constant 1.000000e+00 : f32
    %99 = vector.broadcast %cst_17 : f32 to vector<8x128xf32>
    %100 = arith.addf %99, %98 : vector<8x128xf32>
    %101 = arith.divf %99, %100 : vector<8x128xf32>
    %102 = math.tanh %96 : vector<8x128xf32>
    %103 = vector.extract_strided_slice %101 {offsets = [0, 32], sizes = [8, 32], strides = [1, 1]} : vector<8x128xf32> to vector<8x32xf32>
    %104 = arith.mulf %103, %90 : vector<8x32xf32>
    %105 = vector.extract_strided_slice %101 {offsets = [0, 0], sizes = [8, 32], strides = [1, 1]} : vector<8x128xf32> to vector<8x32xf32>
    %106 = vector.extract_strided_slice %102 {offsets = [0, 64], sizes = [8, 32], strides = [1, 1]} : vector<8x128xf32> to vector<8x32xf32>
    %107 = arith.mulf %105, %106 : vector<8x32xf32>
    %108 = arith.addf %104, %107 : vector<8x32xf32>
    %109 = vector.extract_strided_slice %101 {offsets = [0, 96], sizes = [8, 32], strides = [1, 1]} : vector<8x128xf32> to vector<8x32xf32>
    %110 = math.tanh %108 : vector<8x32xf32>
    %111 = arith.mulf %109, %110 : vector<8x32xf32>
    %112 = vector.extract_strided_slice %8 {offsets = [48, 0], sizes = [8, 128], strides = [1, 1]} : vector<64x128xf32> to vector<8x128xf32>
    %cst_18 = arith.constant dense<0.000000e+00> : vector<8x128xf32>
    %113 = tpu.matmul %111, %1, %cst_18 {dimension_numbers = #tpu.dot_dimension_numbers<[1], [0], [0], [1], [0, 0, 1, 1], [], []>} : vector<8x32xf32>, vector<32x128xf32>, vector<8x128xf32> -> vector<8x128xf32>
    %114 = arith.addf %112, %113 : vector<8x128xf32>
    %115 = arith.negf %114 : vector<8x128xf32>
    %116 = math.exp %115 : vector<8x128xf32>
    %cst_19 = arith.constant 1.000000e+00 : f32
    %117 = vector.broadcast %cst_19 : f32 to vector<8x128xf32>
    %118 = arith.addf %117, %116 : vector<8x128xf32>
    %119 = arith.divf %117, %118 : vector<8x128xf32>
    %120 = math.tanh %114 : vector<8x128xf32>
    %121 = vector.extract_strided_slice %119 {offsets = [0, 32], sizes = [8, 32], strides = [1, 1]} : vector<8x128xf32> to vector<8x32xf32>
    %122 = arith.mulf %121, %108 : vector<8x32xf32>
    %123 = vector.extract_strided_slice %119 {offsets = [0, 0], sizes = [8, 32], strides = [1, 1]} : vector<8x128xf32> to vector<8x32xf32>
    %124 = vector.extract_strided_slice %120 {offsets = [0, 64], sizes = [8, 32], strides = [1, 1]} : vector<8x128xf32> to vector<8x32xf32>
    %125 = arith.mulf %123, %124 : vector<8x32xf32>
    %126 = arith.addf %122, %125 : vector<8x32xf32>
    %127 = vector.extract_strided_slice %119 {offsets = [0, 96], sizes = [8, 32], strides = [1, 1]} : vector<8x128xf32> to vector<8x32xf32>
    %128 = math.tanh %126 : vector<8x32xf32>
    %129 = arith.mulf %127, %128 : vector<8x32xf32>
    %130 = vector.extract_strided_slice %8 {offsets = [56, 0], sizes = [8, 128], strides = [1, 1]} : vector<64x128xf32> to vector<8x128xf32>
    %cst_20 = arith.constant dense<0.000000e+00> : vector<8x128xf32>
    %131 = tpu.matmul %129, %1, %cst_20 {dimension_numbers = #tpu.dot_dimension_numbers<[1], [0], [0], [1], [0, 0, 1, 1], [], []>} : vector<8x32xf32>, vector<32x128xf32>, vector<8x128xf32> -> vector<8x128xf32>
    %132 = arith.addf %130, %131 : vector<8x128xf32>
    %133 = arith.negf %132 : vector<8x128xf32>
    %134 = math.exp %133 : vector<8x128xf32>
    %cst_21 = arith.constant 1.000000e+00 : f32
    %135 = vector.broadcast %cst_21 : f32 to vector<8x128xf32>
    %136 = arith.addf %135, %134 : vector<8x128xf32>
    %137 = arith.divf %135, %136 : vector<8x128xf32>
    %138 = math.tanh %132 : vector<8x128xf32>
    %139 = vector.extract_strided_slice %137 {offsets = [0, 32], sizes = [8, 32], strides = [1, 1]} : vector<8x128xf32> to vector<8x32xf32>
    %140 = arith.mulf %139, %126 : vector<8x32xf32>
    %141 = vector.extract_strided_slice %137 {offsets = [0, 0], sizes = [8, 32], strides = [1, 1]} : vector<8x128xf32> to vector<8x32xf32>
    %142 = vector.extract_strided_slice %138 {offsets = [0, 64], sizes = [8, 32], strides = [1, 1]} : vector<8x128xf32> to vector<8x32xf32>
    %143 = arith.mulf %141, %142 : vector<8x32xf32>
    %144 = arith.addf %140, %143 : vector<8x32xf32>
    %145 = vector.extract_strided_slice %137 {offsets = [0, 96], sizes = [8, 32], strides = [1, 1]} : vector<8x128xf32> to vector<8x32xf32>
    %146 = math.tanh %144 : vector<8x32xf32>
    %147 = arith.mulf %145, %146 : vector<8x32xf32>
    %cst_22 = arith.constant dense<0.000000e+00> : vector<8x128xf32>
    %148 = tpu.matmul %147, %3, %cst_22 {dimension_numbers = #tpu.dot_dimension_numbers<[1], [0], [0], [1], [0, 0, 1, 1], [], []>} : vector<8x32xf32>, vector<32x128xf32>, vector<8x128xf32> -> vector<8x128xf32>
    %149 = vector.broadcast %4 : vector<1x128xf32> to vector<8x128xf32>
    %150 = arith.addf %148, %149 : vector<8x128xf32>
    %c0_23 = arith.constant 0 : index
    %c0_24 = arith.constant 0 : index
    %151 = vector.load %arg2[%c0_23, %c0_24] : memref<8x128xf32, #tpu.memory_space<vmem>>, vector<8x128xf32>
    tpu.vector_store %arg2[%c0_23, %c0_24], %150 {strides = array<i32>} : memref<8x128xf32, #tpu.memory_space<vmem>>, vector<8x128xf32>,
    return
  }
}

</mosaic_0001>

<bundles_post_ra>
// kernel: tpu_custom_call.1
= control target key start
LH: loop header
LB: loop body
LE: loop exit
PB: predicated region body
PF: predicated region fallthrough
CT: control target
= control target key end

     0   :  { %7 = vsyncpa [#allocation3], 0  ;;  %s1541_s0 = inlined_call_operand.vmem [shape: f32[64,16], index: 0, kind: input, shape index: {}]   ;;  %s1542_s1 = inlined_call_operand.hbm [shape: f32[96,128], index: 1, kind: input, shape index: {}]   ;;  %s1543_s2 = inlined_call_operand.hbm [shape: f32[8,128], index: 2, kind: output, shape index: {}]  }
   0x1   :  { %8 = vsyncpa [#allocation4], 0  ;;  %s1352_s9 = smov [#allocation2]   ;;  %s1304_s13 = scalar_lea.hbm %s1542_s1, 1536 }
   0x2   :  { %s16_s10 = sshll.u32 %s1352_s9, 4  ;;  %p1305_p0 = scmp.ne.s32.totalorder %s1542_s1, %s1304_s13  ;;  %s17_s10 = int_to_ptr.vmem [resolvable:$true] %s16_s10 }
   0x3   :  { %p1308_p1 = scmp.lt.u32.totalorder %s1304_s13, %s1542_s1 }
   0x5   :  { %p1310_p2 = pnand %p1308_p1, %p1305_p0 }
   0x7   :  { %1313 = shalt.err (!%p1310_p2)
}
   0x8   :  { %s1314_s18 = scalar_lea.vmem %s17_s10, 1536  ;;  %p1319_p4 = scmp.lt.s32.totalorder %s17_s10, %s17_s10 }
   0x9   :  { %p1315_p3 = scmp.ne.s32.totalorder %s17_s10, %s1314_s18  ;;  %p1320_p5 = scmp.lt.s32.totalorder %s1314_s18, %s1314_s18 }
   0xb   :  { %p1321_p6 = por %p1320_p5, %p1319_p4 }
   0xd   :  { %p1322_p7 = pnand %p1321_p6, %p1315_p3 }
   0xf   :  { %1325 = shalt.err (!%p1322_p7)
}
  0x10   :  { %s1353_s19 = smov 128   ;;  %s1354_s20 = smov 8  }
  0x11   :  { %22 = dma.hbm_to_vmem [thread:$0]  %s1542_s1, 1536, %s17_s10, [#allocation3], %s1353_s19, %s1353_s19, %s1354_s20  }
  0x12   :  { %1348 = dma.done.wait [#allocation3], 1536  }
  0x13   :  { %1349 = vsyncadd [#allocation3], 4294965760  ;;  %vm50_vm0 = vcmask 130048   ;;  %v26_v0 = vld [vmem:[#allocation2] sm:$0xff]  ;;  %v27_v1 = vld [vmem:[#allocation2 + $0x8] sm:$0xff]  ;;  %s1355_s1 = smov 64  }
  0x14   :  { %v38_v2 = vld [vmem:[%s1541_s0] sm:$0xff]  ;;  %v1178_v3 = vpack.c.bf16 %v27_v1, %v26_v0  ;;  %v39_v4 = vld [vmem:[%s1541_s0 + $0x8] sm:$0xff]  ;;  %v1397_v5 = vld [vmem:[#allocation2 + $0x30] ss:$0 sm:$0xff]  ;;  %v1356_v19 = vmov 0.0|0.0   ;;  %vm1357_vm1 = vmmov 0  }
  0x15   :  { %1078 = vmatprep.mubr.msk.f32.mxu0 %vm50_vm0, %v38_v2  ;;  %v28_v16 = vld [vmem:[#allocation2 + $0x10] sm:$0xff]  ;;  %v29_v17 = vld [vmem:[#allocation2 + $0x18] sm:$0xff]  ;;  %v30_v18 = vld [vmem:[#allocation2 + $0x20] sm:$0xff]  ;;  %1182 = vmatprep.subr.bf16.mxu1 %v1356_v19  ;;  %v1358_v22 = vmov 0.0   ;;  %s1359_s27 = smov 96   ;;  %s1360_s28 = smov 32  }
  0x16   :  { %1179 = vmatprep.subr.bf16.mxu0 %v1178_v3  ;;  %v1402_v20 = vpack.c.bf16 %v29_v17, %v28_v16  ;;  %v31_v21 = vld [vmem:[#allocation2 + $0x28] sm:$0xff]  ;;  %1098 = vmatprep.mubr.msk.f32.mxu1 %vm1357_vm1, %v1358_v22  ;;  %vm201_vm2 = vcmask 261120   ;;  %v40_v43 = vld [vmem:[%s1541_s0 + $0x10] sm:$0xff]  ;;  %v41_v44 = vld [vmem:[%s1541_s0 + $0x18] sm:$0xff] }
  0x17   :  { %1181 = vmatpush3.bf16.msra.mxu0 %v1178_v3  ;;  %v1408_v23 = vpack.c.bf16 %v31_v21, %v30_v18  ;;  %v42_v1 = vld [vmem:[%s1541_s0 + $0x20] sm:$0xff]  ;;  %v43_v2 = vld [vmem:[%s1541_s0 + $0x28] sm:$0xff]  ;;  %v44_v3 = vld [vmem:[%s1541_s0 + $0x30] sm:$0xff] }
  0x18   :  { %1194 = vmatprep.subr.bf16.mxu0 %v1356_v19  ;;  %1184 = vmatpush3.bf16.msra.mxu1 %v1402_v20 }
  0x19   :  { %1185 = vmatprep.subr.bf16.mxu1 %v1356_v19 }
  0x1a   :  { %1079 = vmatmul.mubr.msk.f32.vlgmr.msra.gmra.mrb[0].mxu0 %vm50_vm0, %v39_v4  ;;  %v45_v4 = vld [vmem:[%s1541_s0 + $0x38] sm:$0xff]  ;;  %s1361_s0 = smov [#allocation5]  }
  0x1b   :  { %1196 = vmatpush3.bf16.msra.mxu0 %v1402_v20  ;;  %1081 = vmatprep.mubr.msk.f32.mxu0 %vm50_vm0, %v40_v43  ;;  %s989_s13 = sshll.u32 %s1361_s0, 4  ;;  %s990_s13 = int_to_ptr.vmem [resolvable:$true] %s989_s13 }
  0x1c   :  { %1197 = vmatprep.subr.bf16.mxu0 %v1356_v19  ;;  %1187 = vmatpush3.bf16.msra.mxu1 %v1408_v23  ;;  %s1326_s14 = scalar_lea.vmem %s990_s13, 128  ;;  %p1331_p9 = scmp.lt.s32.totalorder %s990_s13, %s990_s13 }
  0x1d   :  { %1188 = vmatprep.subr.bf16.mxu1 %v1356_v19  ;;  %p1327_p8 = scmp.ne.s32.totalorder %s990_s13, %s1326_s14  ;;  %p1332_p10 = scmp.lt.s32.totalorder %s1326_s14, %s1326_s14 }
  0x1e   :  { %1082 = vmatmul.mubr.msk.f32.gmra.mrb[2].mxu0 %vm50_vm0, %v41_v44 }
  0x1f   :  { %1199 = vmatpush3.bf16.msra.mxu0 %v1408_v23  ;;  %1084 = vmatprep.mubr.msk.f32.mxu0 %vm50_vm0, %v42_v1  ;;  %p1333_p11 = por %p1332_p10, %p1331_p9 }
  0x20   :  { %1206 = vmatprep.subr.bf16.mxu0 %v1356_v19 }
  0x21   :  { %p1334_p12 = pnand %p1333_p11, %p1327_p8 }
  0x22   :  { %1085 = vmatmul.mubr.msk.f32.gmra.mrb[4].mxu0 %vm50_vm0, %v43_v2 }
  0x23   :  { %1087 = vmatprep.mubr.msk.f32.mxu0 %vm50_vm0, %v44_v3 }
  0x26   :  { %1088 = vmatmul.mubr.msk.f32.gmra.mrb[6].mxu0 %vm50_vm0, %v45_v4 }
  0x27   :  { %1120 = vmatprep.mubr.msk.f32.mxu0 %vm1357_vm1, %v1358_v22 }
  0xed   :  { %v1080_v6 = vpop.f32.mrb[0].mxu0 }
  0xee   :  { %v141_v7 = vpop.f32.mrb[1].mxu0  ;;  %v147_v28 = vadd.f32 %v1080_v6, %v1397_v5 }
  0xef   :  { %v142_v8 = vadd.f32 %v1397_v5, %v141_v7 }
  0xf1   :  { %1240 = vtanh.f32 %v142_v8  ;;  %v1007_v10 = vmul.f32 -1.442695, %v142_v8  ;;  %v1083_v48 = vpop.f32.mrb[2].mxu0 }
  0xf2   :  { %v151_v49 = vpop.f32.mrb[3].mxu0 }
  0xf3   :  { %1242 = vpow2.f32 %v1007_v10  ;;  %v152_v51 = vadd.f32 %v1397_v5, %v151_v49 }
  0xfb   :  { %v1241_v9 = vpop.eup %1240 }
  0xfc   :  { %188 = vrot.lane.b32.xlu0 %v1241_v9, %s1355_s1  ;;  %v1469_v9 = vpop.f32.mrb[4].mxu0 }
  0xfd   :  { %v1243_v11 = vpop.eup %1242  ;;  %v161_v10 = vpop.f32.mrb[5].mxu0 }
  0xfe   :  { %v183_v12 = vadd.f32 1.0, %v1243_v11  ;;  %v1471_v11 = vpop.f32.mrb[6].mxu0 }
 0x100   :  { %1244 = vrcp.f32 %v183_v12  ;;  %v1473_v12 = vpop.f32.mrb[7].mxu0 }
 0x10a   :  { %v1245_v13 = vpop.eup %1244 }
 0x16e   :  { %v189_v14 = vpop.permute.xlu0 %188 }
 0x16f   :  { %v191_v15 = vmul.f32 %v1245_v13, %v189_v14  ;;  %v157_v14 = vadd.f32 %v1083_v48, %v1397_v5 }
 0x171   :  { %1246 = vtanh.f32 %v191_v15 }
 0x17b   :  { %v1247_v24 = vpop.eup %1246 }
 0x17c   :  { %194 = vrot.lane.b32.xlu0 %v1247_v24, %s1359_s27 }
 0x180   :  { %283 = vrot.lane.b32.xlu0 %v191_v15, %s1360_s28 }
 0x1ee   :  { %v195_v25 = vpop.permute.xlu0 %194 }
 0x1ef   :  { %v197_v26 = vmul.f32 %v1245_v13, %v195_v25 }
 0x1f1   :  { %199 = vrot.lane.b32.xlu1 %v197_v26, %s1360_s28 }
 0x1f2   :  { %v284_v39 = vpop.permute.xlu0 %283 }
 0x263   :  { %v200_v27 = vpop.permute.xlu1 %199 }
 0x264   :  { %1099 = vmatmul.mubr.msk.f32.vlgmr.msra.gmra.mrb[0].mxu1 %vm201_vm2, %v200_v27 }
 0x265   :  { %1190 = vmatpush3.bf16.msra.mxu1 %v1402_v20  ;;  %1109 = vmatprep.mubr.msk.f32.mxu1 %vm1357_vm1, %v1358_v22 }
 0x266   :  { %1191 = vmatprep.subr.bf16.mxu1 %v1356_v19 }
 0x269   :  { %1193 = vmatpush3.bf16.msra.mxu1 %v1408_v23 }
 0x26a   :  { %1200 = vmatprep.subr.bf16.mxu1 %v1356_v19 }
 0x337   :  { %v270_v29 = vpop.f32.mrb[0].mxu1 }
 0x338   :  { %v274_v30 = vadd.f32 %v270_v29, %v147_v28  ;;  %v1100_v31 = vpop.f32.mrb[1].mxu1 }
 0x33a   :  { %1248 = vtanh.f32 %v274_v30  ;;  %v1009_v33 = vmul.f32 -1.442695, %v274_v30 }
 0x33c   :  { %1250 = vpow2.f32 %v1009_v33 }
 0x344   :  { %v1249_v32 = vpop.eup %1248 }
 0x345   :  { %288 = vrot.lane.b32.xlu1 %v1249_v32, %s1355_s1 }
 0x346   :  { %v1251_v34 = vpop.eup %1250 }
 0x347   :  { %v278_v35 = vadd.f32 1.0, %v1251_v34 }
 0x349   :  { %1252 = vrcp.f32 %v278_v35 }
 0x353   :  { %v1253_v36 = vpop.eup %1252 }
 0x354   :  { %v286_v40 = vmul.f32 %v1253_v36, %v284_v39 }
 0x3b7   :  { %v289_v37 = vpop.permute.xlu1 %288 }
 0x3b8   :  { %v291_v38 = vmul.f32 %v1253_v36, %v289_v37 }
 0x3ba   :  { %293 = vrot.lane.b32.xlu1 %v291_v38, %s1360_s28 }
 0x42c   :  { %v294_v41 = vpop.permute.xlu1 %293 }
 0x42d   :  { %v296_v42 = vadd.f32 %v294_v41, %v286_v40 }
 0x42f   :  { %1254 = vtanh.f32 %v296_v42 }
 0x439   :  { %v1255_v45 = vpop.eup %1254 }
 0x43a   :  { %299 = vrot.lane.b32.xlu0 %v1255_v45, %s1355_s1 }
 0x4ac   :  { %v300_v46 = vpop.permute.xlu0 %299 }
 0x4ad   :  { %v302_v47 = vmul.f32 %v1253_v36, %v300_v46  ;;  %v162_v36 = vadd.f32 %v1397_v5, %v161_v10 }
 0x4af   :  { %304 = vrot.lane.b32.xlu1 %v302_v47, %s1360_s28 }
 0x521   :  { %v305_v50 = vpop.permute.xlu1 %304 }
 0x522   :  { %1110 = vmatmul.mubr.msk.f32.vlgmr.msra.gmra.mrb[2].mxu1 %vm201_vm2, %v305_v50 }
 0x523   :  { %1202 = vmatpush3.bf16.msra.mxu1 %v1402_v20  ;;  %1131 = vmatprep.mubr.msk.f32.mxu1 %vm1357_vm1, %v1358_v22 }
 0x524   :  { %1203 = vmatprep.subr.bf16.mxu1 %v1356_v19 }
 0x527   :  { %1205 = vmatpush3.bf16.msra.mxu1 %v1408_v23 }
 0x528   :  { %1212 = vmatprep.subr.bf16.mxu1 %v1356_v19 }
 0x5f5   :  { %v374_v52 = vpop.f32.mrb[2].mxu1 }
 0x5f6   :  { %v378_v53 = vadd.f32 %v374_v52, %v152_v51  ;;  %v1111_v54 = vpop.f32.mrb[3].mxu1 }
 0x5f7   :  { %v167_v54 = vadd.f32 %v1469_v9, %v1397_v5 }
 0x5f8   :  { %1256 = vtanh.f32 %v378_v53  ;;  %v1011_v56 = vmul.f32 -1.442695, %v378_v53 }
 0x5fa   :  { %1258 = vpow2.f32 %v1011_v56 }
 0x602   :  { %v1257_v55 = vpop.eup %1256 }
 0x603   :  { %388 = vrot.lane.b32.xlu0 %v1257_v55, %s1355_s1 }
 0x604   :  { %v1259_v57 = vpop.eup %1258 }
 0x605   :  { %v382_v58 = vadd.f32 1.0, %v1259_v57 }
 0x607   :  { %1260 = vrcp.f32 %v382_v58 }
 0x611   :  { %v1261_v59 = vpop.eup %1260 }
 0x612   :  { %v386_v62 = vmul.f32 %v1261_v59, %v296_v42 }
 0x675   :  { %v389_v60 = vpop.permute.xlu0 %388 }
 0x676   :  { %v391_v61 = vmul.f32 %v1261_v59, %v389_v60 }
 0x678   :  { %393 = vrot.lane.b32.xlu1 %v391_v61, %s1360_s28 }
 0x6ea   :  { %v394_v63 = vpop.permute.xlu1 %393 }
 0x6eb   :  { %v396_v0 = vadd.f32 %v394_v63, %v386_v62 }
 0x6ed   :  { %1262 = vtanh.f32 %v396_v0 }
 0x6f7   :  { %v1263_v6 = vpop.eup %1262 }
 0x6f8   :  { %399 = vrot.lane.b32.xlu0 %v1263_v6, %s1355_s1 }
 0x76a   :  { %v400_v7 = vpop.permute.xlu0 %399 }
 0x76b   :  { %v402_v8 = vmul.f32 %v1261_v59, %v400_v7  ;;  %v172_v7 = vadd.f32 %v1397_v5, %v1473_v12 }
 0x76d   :  { %404 = vrot.lane.b32.xlu1 %v402_v8, %s1360_s28 }
 0x7df   :  { %v405_v13 = vpop.permute.xlu1 %404 }
 0x7e0   :  { %1121 = vmatmul.mubr.msk.f32.vlgmr.msra.gmra.mrb[8].mxu0 %vm201_vm2, %v405_v13 }
 0x7e1   :  { %1208 = vmatpush3.bf16.msra.mxu0 %v1402_v20  ;;  %1142 = vmatprep.mubr.msk.f32.mxu0 %vm1357_vm1, %v1358_v22 }
 0x7e2   :  { %1209 = vmatprep.subr.bf16.mxu0 %v1356_v19 }
 0x7e5   :  { %1211 = vmatpush3.bf16.msra.mxu0 %v1408_v23 }
 0x7e6   :  { %1218 = vmatprep.subr.bf16.mxu0 %v1356_v19 }
 0x8b3   :  { %v474_v15 = vpop.f32.mrb[8].mxu0 }
 0x8b4   :  { %v478_v16 = vadd.f32 %v474_v15, %v157_v14  ;;  %v1122_v17 = vpop.f32.mrb[9].mxu0 }
 0x8b6   :  { %1264 = vtanh.f32 %v478_v16  ;;  %v1013_v21 = vmul.f32 -1.442695, %v478_v16 }
 0x8b8   :  { %1266 = vpow2.f32 %v1013_v21 }
 0x8c0   :  { %v1265_v18 = vpop.eup %1264 }
 0x8c1   :  { %488 = vrot.lane.b32.xlu0 %v1265_v18, %s1355_s1 }
 0x8c2   :  { %v1267_v24 = vpop.eup %1266 }
 0x8c3   :  { %v482_v25 = vadd.f32 1.0, %v1267_v24 }
 0x8c5   :  { %1268 = vrcp.f32 %v482_v25 }
 0x8cf   :  { %v1269_v26 = vpop.eup %1268 }
 0x8d0   :  { %v486_v29 = vmul.f32 %v1269_v26, %v396_v0 }
 0x933   :  { %v489_v27 = vpop.permute.xlu0 %488 }
 0x934   :  { %v491_v28 = vmul.f32 %v1269_v26, %v489_v27 }
 0x936   :  { %493 = vrot.lane.b32.xlu1 %v491_v28, %s1360_s28 }
 0x9a8   :  { %v494_v30 = vpop.permute.xlu1 %493 }
 0x9a9   :  { %v496_v31 = vadd.f32 %v494_v30, %v486_v29  ;;  %v177_v29 = vadd.f32 %v1471_v11, %v1397_v5  ;;  %v33_v11 = vld [vmem:[#allocation2 + $0x38] sm:$0xff] }
 0x9ab   :  { %1270 = vtanh.f32 %v496_v31 }
 0x9b5   :  { %v1271_v32 = vpop.eup %1270 }
 0x9b6   :  { %499 = vrot.lane.b32.xlu0 %v1271_v32, %s1355_s1 }
 0xa28   :  { %v500_v33 = vpop.permute.xlu0 %499 }
 0xa29   :  { %v502_v34 = vmul.f32 %v1269_v26, %v500_v33 }
 0xa2b   :  { %504 = vrot.lane.b32.xlu1 %v502_v34, %s1360_s28 }
 0xa9d   :  { %v505_v35 = vpop.permute.xlu1 %504 }
 0xa9e   :  { %1132 = vmatmul.mubr.msk.f32.vlgmr.msra.gmra.mrb[4].mxu1 %vm201_vm2, %v505_v35 }
 0xa9f   :  { %1214 = vmatpush3.bf16.msra.mxu1 %v1402_v20  ;;  %1153 = vmatprep.mubr.msk.f32.mxu1 %vm1357_vm1, %v1358_v22 }
 0xaa0   :  { %1215 = vmatprep.subr.bf16.mxu1 %v1356_v19 }
 0xaa3   :  { %1217 = vmatpush3.bf16.msra.mxu1 %v1408_v23 }
 0xaa4   :  { %1224 = vmatprep.subr.bf16.mxu1 %v1356_v19 }
 0xb71   :  { %v574_v37 = vpop.f32.mrb[4].mxu1 }
 0xb72   :  { %v578_v38 = vadd.f32 %v574_v37, %v162_v36  ;;  %v1133_v39 = vpop.f32.mrb[5].mxu1 }
 0xb74   :  { %1272 = vtanh.f32 %v578_v38  ;;  %v1015_v41 = vmul.f32 -1.442695, %v578_v38 }
 0xb76   :  { %1274 = vpow2.f32 %v1015_v41 }
 0xb7e   :  { %v1273_v40 = vpop.eup %1272 }
 0xb7f   :  { %588 = vrot.lane.b32.xlu0 %v1273_v40, %s1355_s1 }
 0xb80   :  { %v1275_v42 = vpop.eup %1274 }
 0xb81   :  { %v582_v43 = vadd.f32 1.0, %v1275_v42  ;;  %v34_v42 = vld [vmem:[#allocation2 + $0x40] sm:$0xff] }
 0xb83   :  { %1276 = vrcp.f32 %v582_v43  ;;  %v35_v43 = vld [vmem:[#allocation2 + $0x48] sm:$0xff] }
 0xb8d   :  { %v1277_v44 = vpop.eup %1276 }
 0xb8e   :  { %v586_v47 = vmul.f32 %v1277_v44, %v496_v31 }
 0xbf1   :  { %v589_v45 = vpop.permute.xlu0 %588 }
 0xbf2   :  { %v591_v46 = vmul.f32 %v1277_v44, %v589_v45  ;;  %v36_v45 = vld [vmem:[#allocation2 + $0x50] sm:$0xff] }
 0xbf4   :  { %593 = vrot.lane.b32.xlu1 %v591_v46, %s1360_s28  ;;  %v1228_v46 = vpack.c.bf16 %v36_v45, %v35_v43 }
 0xc66   :  { %v594_v48 = vpop.permute.xlu1 %593 }
 0xc67   :  { %v596_v49 = vadd.f32 %v594_v48, %v586_v47 }
 0xc69   :  { %1278 = vtanh.f32 %v596_v49 }
 0xc73   :  { %v1279_v50 = vpop.eup %1278 }
 0xc74   :  { %599 = vrot.lane.b32.xlu0 %v1279_v50, %s1355_s1 }
 0xce6   :  { %v600_v51 = vpop.permute.xlu0 %599 }
 0xce7   :  { %v602_v52 = vmul.f32 %v1277_v44, %v600_v51  ;;  %v1225_v44 = vpack.c.bf16 %v34_v42, %v33_v11  ;;  %v1022_v51 = vld [vmem:[#allocation2 + $0x58] ss:$0 sm:$0xff] }
 0xce9   :  { %604 = vrot.lane.b32.xlu1 %v602_v52, %s1360_s28 }
 0xd5b   :  { %v605_v53 = vpop.permute.xlu1 %604 }
 0xd5c   :  { %1143 = vmatmul.mubr.msk.f32.vlgmr.msra.gmra.mrb[10].mxu0 %vm201_vm2, %v605_v53 }
 0xd5d   :  { %1220 = vmatpush3.bf16.msra.mxu0 %v1402_v20  ;;  %1164 = vmatprep.mubr.msk.f32.mxu0 %vm1357_vm1, %v1358_v22 }
 0xd5e   :  { %1221 = vmatprep.subr.bf16.mxu0 %v1356_v19 }
 0xd61   :  { %1223 = vmatpush3.bf16.msra.mxu0 %v1408_v23 }
 0xe2f   :  { %v674_v55 = vpop.f32.mrb[10].mxu0 }
 0xe30   :  { %v678_v56 = vadd.f32 %v674_v55, %v167_v54  ;;  %v1144_v57 = vpop.f32.mrb[11].mxu0 }
 0xe32   :  { %1280 = vtanh.f32 %v678_v56  ;;  %v1017_v59 = vmul.f32 -1.442695, %v678_v56 }
 0xe34   :  { %1282 = vpow2.f32 %v1017_v59 }
 0xe3c   :  { %v1281_v58 = vpop.eup %1280 }
 0xe3d   :  { %688 = vrot.lane.b32.xlu0 %v1281_v58, %s1355_s1 }
 0xe3e   :  { %v1283_v20 = vpop.eup %1282 }
 0xe3f   :  { %v682_v60 = vadd.f32 1.0, %v1283_v20 }
 0xe41   :  { %1284 = vrcp.f32 %v682_v60 }
 0xe4b   :  { %v1285_v61 = vpop.eup %1284 }
 0xe4c   :  { %v686_v23 = vmul.f32 %v1285_v61, %v596_v49 }
 0xeaf   :  { %v689_v62 = vpop.permute.xlu0 %688 }
 0xeb0   :  { %v691_v63 = vmul.f32 %v1285_v61, %v689_v62 }
 0xeb2   :  { %693 = vrot.lane.b32.xlu1 %v691_v63, %s1360_s28 }
 0xf24   :  { %v694_v0 = vpop.permute.xlu1 %693 }
 0xf25   :  { %v696_v1 = vadd.f32 %v694_v0, %v686_v23 }
 0xf27   :  { %1286 = vtanh.f32 %v696_v1 }
 0xf31   :  { %v1287_v2 = vpop.eup %1286 }
 0xf32   :  { %699 = vrot.lane.b32.xlu0 %v1287_v2, %s1355_s1 }
 0xfa4   :  { %v700_v3 = vpop.permute.xlu0 %699 }
 0xfa5   :  { %v702_v4 = vmul.f32 %v1285_v61, %v700_v3 }
 0xfa7   :  { %704 = vrot.lane.b32.xlu1 %v702_v4, %s1360_s28 }
0x1019   :  { %v705_v6 = vpop.permute.xlu1 %704 }
0x101a   :  { %1154 = vmatmul.mubr.msk.f32.vlgmr.msra.gmra.mrb[6].mxu1 %vm201_vm2, %v705_v6 }
0x101b   :  { %1175 = vmatprep.mubr.msk.f32.mxu1 %vm1357_vm1, %v1358_v22  ;;  %1226 = vmatpush3.bf16.msra.mxu1 %v1225_v44 }
0x101c   :  { %1227 = vmatprep.subr.bf16.mxu1 %v1356_v19 }
0x101f   :  { %1229 = vmatpush3.bf16.msra.mxu1 %v1228_v46 }
0x10ed   :  { %v774_v8 = vpop.f32.mrb[6].mxu1 }
0x10ee   :  { %v778_v9 = vadd.f32 %v774_v8, %v172_v7  ;;  %v1155_v10 = vpop.f32.mrb[7].mxu1 }
0x10f0   :  { %1288 = vtanh.f32 %v778_v9  ;;  %v1019_v14 = vmul.f32 -1.442695, %v778_v9 }
0x10f2   :  { %1290 = vpow2.f32 %v1019_v14 }
0x10fa   :  { %v1289_v13 = vpop.eup %1288 }
0x10fb   :  { %788 = vrot.lane.b32.xlu0 %v1289_v13, %s1355_s1 }
0x10fc   :  { %v1291_v15 = vpop.eup %1290 }
0x10fd   :  { %v782_v16 = vadd.f32 1.0, %v1291_v15 }
0x10ff   :  { %1292 = vrcp.f32 %v782_v16 }
0x1109   :  { %v1293_v17 = vpop.eup %1292 }
0x110a   :  { %v786_v22 = vmul.f32 %v1293_v17, %v696_v1 }
0x116d   :  { %v789_v18 = vpop.permute.xlu0 %788 }
0x116e   :  { %v791_v21 = vmul.f32 %v1293_v17, %v789_v18 }
0x1170   :  { %793 = vrot.lane.b32.xlu1 %v791_v21, %s1360_s28 }
0x11e2   :  { %v794_v24 = vpop.permute.xlu1 %793 }
0x11e3   :  { %v796_v12 = vadd.f32 %v794_v24, %v786_v22 }
0x11e5   :  { %1294 = vtanh.f32 %v796_v12 }
0x11ef   :  { %v1295_v25 = vpop.eup %1294 }
0x11f0   :  { %799 = vrot.lane.b32.xlu0 %v1295_v25, %s1355_s1 }
0x1262   :  { %v800_v26 = vpop.permute.xlu0 %799 }
0x1263   :  { %v802_v27 = vmul.f32 %v1293_v17, %v800_v26 }
0x1265   :  { %804 = vrot.lane.b32.xlu1 %v802_v27, %s1360_s28 }
0x12d7   :  { %v805_v28 = vpop.permute.xlu1 %804 }
0x12d8   :  { %1165 = vmatmul.mubr.msk.f32.vlgmr.msra.gmra.mrb[12].mxu0 %vm201_vm2, %v805_v28 }
0x13ab   :  { %v874_v30 = vpop.f32.mrb[12].mxu0 }
0x13ac   :  { %v878_v31 = vadd.f32 %v874_v30, %v177_v29  ;;  %v1166_v32 = vpop.f32.mrb[13].mxu0 }
0x13ae   :  { %1296 = vtanh.f32 %v878_v31  ;;  %v1021_v34 = vmul.f32 -1.442695, %v878_v31 }
0x13b0   :  { %1298 = vpow2.f32 %v1021_v34 }
0x13b8   :  { %v1297_v33 = vpop.eup %1296 }
0x13b9   :  { %888 = vrot.lane.b32.xlu0 %v1297_v33, %s1355_s1 }
0x13ba   :  { %v1299_v35 = vpop.eup %1298 }
0x13bb   :  { %v882_v36 = vadd.f32 1.0, %v1299_v35 }
0x13bd   :  { %1300 = vrcp.f32 %v882_v36 }
0x13c7   :  { %v1301_v37 = vpop.eup %1300 }
0x13c8   :  { %v886_v40 = vmul.f32 %v1301_v37, %v796_v12 }
0x142b   :  { %v889_v38 = vpop.permute.xlu0 %888 }
0x142c   :  { %v891_v39 = vmul.f32 %v1301_v37, %v889_v38 }
0x142e   :  { %893 = vrot.lane.b32.xlu1 %v891_v39, %s1360_s28 }
0x14a0   :  { %v894_v41 = vpop.permute.xlu1 %893 }
0x14a1   :  { %v896_v5 = vadd.f32 %v894_v41, %v886_v40 }
0x14a3   :  { %1302 = vtanh.f32 %v896_v5 }
0x14ad   :  { %v1303_v47 = vpop.eup %1302 }
0x14ae   :  { %899 = vrot.lane.b32.xlu0 %v1303_v47, %s1355_s1 }
0x1520   :  { %v900_v48 = vpop.permute.xlu0 %899 }
0x1521   :  { %v902_v49 = vmul.f32 %v1301_v37, %v900_v48 }
0x1523   :  { %908 = vrot.lane.b32.xlu1 %v902_v49, %s1360_s28 }
0x1595   :  { %v909_v50 = vpop.permute.xlu1 %908 }
0x1596   :  { %1176 = vmatmul.mubr.msk.f32.vlgmr.msra.gmra.mrb[8].mxu1 %vm201_vm2, %v909_v50 }
0x1669   :  { %v978_v52 = vpop.f32.mrb[8].mxu1 }
0x166a   :  { %v979_v53 = vadd.f32 %v1022_v51, %v978_v52  ;;  %v1177_v54 = vpop.f32.mrb[9].mxu1 }
0x166c   :  { %982 = vst [vmem:[#allocation5] sm:$0xff] %v979_v53 }
0x166d   :  { %1337 = shalt.err (!%p1334_p12)
}
0x166e   :  { %s1338_s17 = scalar_lea.hbm %s1543_s2, 128 }
0x166f   :  { %p1339_p13 = scmp.ne.s32.totalorder %s1543_s2, %s1338_s17  ;;  %p1342_p0 = scmp.lt.u32.totalorder %s1338_s17, %s1543_s2 }
0x1671   :  { %p1344_p1 = pnand %p1342_p0, %p1339_p13 }
0x1673   :  { %1347 = shalt.err (!%p1344_p1)
}
0x1674   :  { %992 = dma.vmem_to_hbm [thread:$0]  %s990_s13, 128, %s1543_s2, [#allocation4]  }
0x1675   :  { %1350 = dma.done.wait [#allocation4], 128  }
0x1676   :  { %1351 = vsyncadd [#allocation4], 4294967168 }
0x1677   :  { %996 = vsyncpa [#allocation3], 1 }
0x1678   :  { %997 = vsyncpa [#allocation4], 1 }

</bundles_post_ra>
